<compile_context>
chip_gen: v5e
topology: v5e:2x2
jax: 0.10.0
libtpu: 0.0.40
codegen_flags: <defaults>
</compile_context>

<pallas_src>
import jax
import jax.numpy as jnp
from jax.experimental import pallas as pl
from jax.experimental.pallas import tpu as pltpu


def _round_up(x, m):
    return -(-x // m) * m


def _cdiv(a, b):
    return -(-a // b)


def _reverb_kernel(scalars_ref, lane_ref, x_ref, o_ref):
    """One (block_b, block_n) tile: out = x * (blk_scale * lane_base) (+ idx)."""
    jt = pl.program_id(1)                      # time-tile index

    sig_w = scalars_ref[0]                     # sigmoid(wetdry)
    scale = scalars_ref[1 + jt]                # exp(coef * block_start)

    dcy = scale * lane_ref[...]                # (1, block_n) f32
    xv = x_ref[...]
    if xv.dtype != jnp.float32:
        xv = xv.astype(jnp.float32)
    o_ref[...] = (xv * dcy).astype(o_ref.dtype)

    # Identity term: add sigmoid(wetdry) at time sample 0 only (first time
    # tile, lane 0) as a narrow single-column RMW -- essentially free.
    @pl.when(jt == 0)
    def _():
        col = o_ref[:, :1].astype(jnp.float32) + sig_w
        o_ref[:, :1] = col.astype(o_ref.dtype)


def reverb_forward(impulse, wetdry, decay, *, block_bytes=4 << 20):
    """impulse: (B, N) float; wetdry/decay: (1,)-shaped float parameters."""
    B, N = impulse.shape
    out_dtype = impulse.dtype if jnp.issubdtype(impulse.dtype, jnp.floating) else jnp.float32
    in_isz = jnp.dtype(impulse.dtype).itemsize
    out_isz = jnp.dtype(out_dtype).itemsize

    # ---------------- blocking (all static Python math) ----------------
    n128 = _cdiv(N, 128)                       # 128-lane tiles along time
    base_b = B if B <= 8 else 8

    # Time (lane) blocking: big lane-dense blocks within the byte budget.
    max_chunks = max(1, block_bytes // (base_b * in_isz * 128))
    chunks = min(n128, max_chunks)
    block_n = chunks * 128
    grid_n = _cdiv(N, block_n)

    # Batch (sublane) blocking: full B if small, else multiples of 8 within budget.
    if B <= 8:
        block_b = B
    else:
        bb = max(8, (block_bytes // (in_isz * block_n)) // 8 * 8)
        block_b = min(bb, _round_up(B, 8))
    grid_b = _cdiv(B, block_b)

    # Guarantee >= 2 grid steps when possible (v7x has 2 TensorCores).
    if grid_b * grid_n == 1:
        if n128 >= 2:
            block_n = (_round_up(n128, 2) // 2) * 128
            grid_n = _cdiv(N, block_n)
        elif B > 8:
            block_b = max(8, _round_up(_cdiv(B, 2), 8))
            grid_b = _cdiv(B, block_b)

    # ---------------- hoisted scalar / per-lane precompute ----------------
    wetdry = jnp.asarray(wetdry, jnp.float32).reshape(-1)[:1]     # (1,)
    decay = jnp.asarray(decay, jnp.float32).reshape(-1)[:1]       # (1,)
    sig_w = jax.nn.sigmoid(wetdry)                                # (1,)
    sig_1mw = jax.nn.sigmoid(1.0 - wetdry)                        # (1,)
    rate = jnp.exp(decay) + 2.0                                   # (1,)
    inv = (1.0 / (N - 1)) if N > 1 else 0.0
    coef = -rate * inv                                            # (1,)

    lane = jnp.arange(block_n, dtype=jnp.float32)
    lane_base = (sig_1mw * jnp.exp(coef * lane)).reshape(1, block_n).astype(jnp.float32)

    blk_start = jnp.arange(grid_n, dtype=jnp.float32) * float(block_n)
    blk_scale = jnp.exp(coef * blk_start)                         # (grid_n,)
    scalars = jnp.concatenate([sig_w, blk_scale]).astype(jnp.float32)  # (1 + grid_n,)

    # ---------------- VMEM budget / cost hint ----------------
    in_blk = block_b * block_n * in_isz
    out_blk = block_b * block_n * out_isz
    lane_bytes = block_n * 4
    vmem_need = 2 * in_blk + 2 * out_blk + 2 * lane_bytes + (6 << 20)
    vmem_limit = int(min(max(vmem_need, 8 << 20), 48 << 20))

    cost = pl.CostEstimate(
        flops=2 * B * N,
        transcendentals=0,
        bytes_accessed=B * N * (in_isz + out_isz) + lane_bytes,
    )

    grid = (grid_b, grid_n)

    out = pl.pallas_call(
        _reverb_kernel,
        out_shape=jax.ShapeDtypeStruct((B, N), out_dtype),
        grid_spec=pltpu.PrefetchScalarGridSpec(
            num_scalar_prefetch=1,
            grid=grid,
            in_specs=[
                pl.BlockSpec((1, block_n), lambda i, j, s: (0, 0)),            # lane_base (resident)
                pl.BlockSpec((block_b, block_n), lambda i, j, s: (i, j)),      # input tile
            ],
            out_specs=pl.BlockSpec((block_b, block_n), lambda i, j, s: (i, j)),
        ),
        compiler_params=pltpu.CompilerParams(
            dimension_semantics=("parallel", "parallel"),
            vmem_limit_bytes=vmem_limit,
        ),
        cost_estimate=cost,
    )(scalars, lane_base, impulse)

    return out


def reverb_reference(impulse, wetdry, decay):
    """Pure-JAX reference mirroring the PyTorch forward."""
    B, N = impulse.shape
    identity = jnp.zeros((1, N), jnp.float32).at[:, 0].set(1.0)
    idx = jax.nn.sigmoid(wetdry) * identity
    imp = jax.nn.sigmoid(1.0 - wetdry) * impulse
    dcy = jnp.exp(-(jnp.exp(decay) + 2.0) * jnp.linspace(0.0, 1.0, N))
    return idx + imp * dcy


if __name__ == "__main__":
    # Deterministic parameter init matching the module: decay = 2.0, wetdry = 4.0
    decay = jnp.array([2.0], dtype=jnp.float32)
    wetdry = jnp.array([4.0], dtype=jnp.float32)

    fwd = jax.jit(reverb_forward)

    # Case 1: tile-aligned size.
    B, SIZE = 2, 1024
    key = jax.random.PRNGKey(0)
    impulse_in = jax.random.normal(key, (B, SIZE), dtype=jnp.float32)
    out = jax.block_until_ready(fwd(impulse_in, wetdry, decay))
    ref = reverb_reference(impulse_in, wetdry[0], decay[0])
    assert out.shape == (B, SIZE)
    assert jnp.allclose(out, ref, atol=1e-5, rtol=1e-5), "mismatch vs reference (aligned)"

    # Case 2: ragged size (not a multiple of 128) -> masked boundary block,
    # no wrapper-side pad/slice copies.
    B2, SIZE2 = 2, 1000
    x2 = jax.random.normal(jax.random.PRNGKey(1), (B2, SIZE2), dtype=jnp.float32)
    out2 = jax.block_until_ready(fwd(x2, wetdry, decay))
    ref2 = reverb_reference(x2, wetdry[0], decay[0])
    assert out2.shape == (B2, SIZE2)
    assert jnp.allclose(out2, ref2, atol=1e-5, rtol=1e-5), "mismatch vs reference (ragged)"

    print("KERNEL_OK")
</pallas_src>

<mosaic_0001>
module attributes {stable_mosaic.version = 11 : i64} {
  func.func @_reverb_kernel(%arg0: i32, %arg1: i32, %arg2: memref<3xf32, #tpu.memory_space<smem>>, %arg3: memref<1x512xf32, #tpu.memory_space<vmem>>, %arg4: memref<2x512xf32, #tpu.memory_space<vmem>>, %arg5: memref<2x512xf32, #tpu.memory_space<vmem>>) attributes {dimension_semantics = [#tpu.dimension_semantics<parallel>, #tpu.dimension_semantics<parallel>], iteration_bounds = array<i64: 1, 2>, scalar_prefetch = 1 : i64, scratch_operands = 0 : i64, tpu.core_type = #tpu.core_type<tc>, window_params = [{pipeline_mode = #tpu.pipeline_mode<synchronous>, transform_indices = @transform_0, window_bounds = array<i64: 1, 512>}, {transform_indices = @transform_1, window_bounds = array<i64: 2, 512>}, {transform_indices = @transform_2, window_bounds = array<i64: 2, 512>}]} {
    %c0 = arith.constant 0 : index
    %0 = memref.load %arg2[%c0] : memref<3xf32, #tpu.memory_space<smem>>
    %c1_i32 = arith.constant 1 : i32
    %1 = arith.addi %c1_i32, %arg1 : i32
    %2 = arith.index_cast %1 : i32 to index
    %3 = memref.load %arg2[%2] : memref<3xf32, #tpu.memory_space<smem>>
    %c0_0 = arith.constant 0 : index
    %c0_1 = arith.constant 0 : index
    %4 = vector.load %arg3[%c0_0, %c0_1] : memref<1x512xf32, #tpu.memory_space<vmem>>, vector<1x512xf32>
    %5 = vector.broadcast %3 : f32 to vector<1x512xf32>
    %6 = arith.mulf %5, %4 : vector<1x512xf32>
    %c0_2 = arith.constant 0 : index
    %c0_3 = arith.constant 0 : index
    %7 = vector.load %arg4[%c0_2, %c0_3] : memref<2x512xf32, #tpu.memory_space<vmem>>, vector<2x512xf32>
    %8 = vector.broadcast %6 : vector<1x512xf32> to vector<2x512xf32>
    %9 = arith.mulf %7, %8 : vector<2x512xf32>
    %c0_4 = arith.constant 0 : index
    %c0_5 = arith.constant 0 : index
    %10 = vector.load %arg5[%c0_4, %c0_5] : memref<2x512xf32, #tpu.memory_space<vmem>>, vector<2x512xf32>
    tpu.vector_store %arg5[%c0_4, %c0_5], %9 {strides = array<i32>} : memref<2x512xf32, #tpu.memory_space<vmem>>, vector<2x512xf32>,
    %c0_i32 = arith.constant 0 : i32
    %11 = arith.cmpi eq, %arg1, %c0_i32 : i32
    %12 = arith.extui %11 : i1 to i32
    %c0_i32_6 = arith.constant 0 : i32
    %13 = arith.cmpi ne, %12, %c0_i32_6 : i32
    scf.if %13 {
      %c0_7 = arith.constant 0 : index
      %c0_8 = arith.constant 0 : index
      %14 = vector.load %arg5[%c0_7, %c0_8] : memref<2x512xf32, #tpu.memory_space<vmem>>, vector<2x1xf32>
      %15 = vector.broadcast %0 : f32 to vector<2x1xf32>
      %16 = arith.addf %14, %15 : vector<2x1xf32>
      %c0_9 = arith.constant 0 : index
      %c0_10 = arith.constant 0 : index
      %17 = vector.load %arg5[%c0_9, %c0_10] : memref<2x512xf32, #tpu.memory_space<vmem>>, vector<2x1xf32>
      tpu.vector_store %arg5[%c0_9, %c0_10], %16 {strides = array<i32>} : memref<2x512xf32, #tpu.memory_space<vmem>>, vector<2x1xf32>,
    } else {
    }
    return
  }
  func.func @transform_0(%arg0: i32, %arg1: i32, %arg2: memref<3xf32, #tpu.memory_space<smem>>) -> (i32, i32) {
    %c0_i32 = arith.constant 0 : i32
    %c0_i32_0 = arith.constant 0 : i32
    %c0_i32_1 = arith.constant 0 : i32
    return %c0_i32, %c0_i32_0 : i32, i32
  }
  func.func @transform_1(%arg0: i32, %arg1: i32, %arg2: memref<3xf32, #tpu.memory_space<smem>>) -> (i32, i32) {
    %c0_i32 = arith.constant 0 : i32
    return %arg0, %arg1 : i32, i32
  }
  func.func @transform_2(%arg0: i32, %arg1: i32, %arg2: memref<3xf32, #tpu.memory_space<smem>>) -> (i32, i32) {
    %c0_i32 = arith.constant 0 : i32
    return %arg0, %arg1 : i32, i32
  }
}

</mosaic_0001>

<bundles_post_ra>
// kernel: reverb_forward.1
= control target key start
LH: loop header
LB: loop body
LE: loop exit
PB: predicated region body
PF: predicated region fallthrough
CT: control target
= control target key end

     0   :  { %s475_s15 = smov [#allocation3]   ;;  %s607_s0 = inlined_call_operand.vmem [shape: f32[3], index: 0, kind: input, shape index: {}]   ;;  %s608_s1 = inlined_call_operand.vmem [shape: f32[1,512], index: 1, kind: input, shape index: {}]   ;;  %s609_s2 = inlined_call_operand.vmem [shape: f32[2,1024], index: 2, kind: input, shape index: {}]   ;;  %s610_s3 = inlined_call_operand.hbm [shape: f32[2,1024], index: 3, kind: output, shape index: {}]  }
   0x1   :  { %s9_s14 = sshll.u32 %s607_s0, 4  ;;  %s10_s14 = int_to_ptr.vmem [resolvable:$true] %s9_s14 }
   0x2   :  { %12 = dma.vmem_to_smem %s10_s14, 16, %s475_s15, [#allocation2] }
   0x3   :  { %445 = dma.done.wait [#allocation2], 16 }
   0x4   :  { %446 = vsyncadd [#allocation2], 4294967280 }
   0x5   :  { %15 = sfence }
   0x6   :  { %16 = vsyncpa [#allocation5], 0 }
   0x7   :  { %18 = vsyncpa [#allocation5 + $0x1], 0  ;;  %s499_s16 = smov 0   ;;  %s501_s17 = smov 0  }
   0x8   :  { %s503_s18 = smov 0   ;;  %s505_s19 = smov 0  }
   0x9   :  { %s507_s20 = smov 0   ;;  %s509_s21 = smov 0  }
   0xa LB: > { %s310_s0 = sadd.s32 4294967295, %s473_s21   ;;  %s311_s22 = sadd.s32 4294967294, %s473_s21   ;;  %s473_s21 = sphi %s509_s21, %s24_s21   ;;  %s469_s20 = sphi %s507_s20, %s617_s20   ;;  %s465_s19 = sphi %s505_s19, %s616_s19   ;;  %s461_s18 = sphi %s503_s18, %s615_s18   ;;  %s457_s17 = sphi %s501_s17, %s614_s17   ;;  %s453_s16 = sphi %s499_s16, %s613_s16  }
   0xb   : > { %s33_s23 = sadd.s32 1, %s469_s20  ;;  %s94_s24 = sadd.s32 1, %s461_s18 }
   0xc   : > { %p34_p0 = scmp.ge.s32.totalorder %s33_s23, 2  ;;  %p104_p1 = scmp.ne.s32.totalorder %s461_s18, %s457_s17 }
   0xd   : > { %p105_p2 = scmp.eq.s32.totalorder %s310_s0, 1  ;;  %p110_p3 = scmp.ne.s32.totalorder %s457_s17, %s453_s16 }
   0xe   : > { %s619_s23 = smov (%p34_p0, %s33_s23), 0  ;;  %p111_p5 = scmp.eq.s32.totalorder %s311_s22, 1 }
   0xf   : > { %p539_p4 = por %p105_p2, %p104_p1  ;;  %s90_s26 = ssub.s32 %s469_s20, %s619_s23 }
  0x10   : > { %p314_p6 = scmp.ge.s32.totalorder %s473_s21, 1  ;;  %p92_p7 = scmp.eq.s32.totalorder %s90_s26, 0 }
  0x11   : > { %p546_p8 = por %p111_p5, %p110_p3  ;;  %p145_p9 = scmp.lt.s32.totalorder %s473_s21, 3 }
  0x12   : > { %s552_s28 = scalar_select %p92_p7, %s461_s18, %s94_s24  }
  0x13   : > { %p146_p10 = pnand %p314_p6, %p145_p9 }
  0x14   : > { %s316_s29 = sshll.u32 (!%p146_p10), %s465_s19, 2  ;;  %s555_s30 = sld [smem:[#allocation3]] (!%p146_p10) }
  0x15   : > { %149 = sbr.rel (%p146_p10) target bundleno = 66 (0x42), region = 28  ;;  %p174_p11 = scmp.lt.s32.totalorder (!%p146_p10), %s316_s29, 7 }
  0x16   : > { %s183_s4 = sadd.s32 (!%p146_p10), 1, %s465_s19  ;;  %s168_s9 = sand.u32 (!%p146_p10), 1, %s457_s17  }
  0x17   : > { %s184_s5 = sld [smem:[#allocation3 + %s183_s4]] (!%p146_p10)  ;;  %s315_s13 = sshll.u32 (!%p146_p10), %s168_s9, 3 }
  0x18   : > { %s170_s14 = scalar_lea.vmem (!%p146_p10), [#allocation4], %s315_s13  ;;  %p318_p12 = scmp.ne.s32.totalorder (!%p146_p10), %s465_s19, 0 }
  0x1a   : > { %s621_s29 = smov (!%p174_p11, %s316_s29), 7  ;;  %v185_v0 = vld [vmem:[%s608_s1] sm:$0xf]  ;;  %vm197_vm0 = vcmask 1041408   ;;  %vm199_vm1 = vcmask 1045508   ;;  %vm201_vm2 = vcmask 1043456  }
  0x1b   : > { %s317_s8 = sshll.u32 %s621_s29, 1 }
  0x1c   : > { %s179_s12 = scalar_lea.vmem %s609_s2, %s317_s8 }
  0x1d   : > { %v186_v1 = vstv %s184_s5  ;;  %v188_v10 = vld [vmem:[%s179_s12] sm:$0xff] }
  0x1e   : > { %v187_v2 = vmul.f32 %v186_v1, %v185_v0 }
  0x20   : > { %v190_v3 = vperm.slane %v187_v2, 0  ;;  %v191_v4 = vperm.slane %v187_v2, 1  ;;  %v192_v5 = vperm.slane %v187_v2, 2  ;;  %v193_v6 = vperm.slane %v187_v2, 3 }
  0x22   : > { %v194_v7 = vrot.slane %v191_v4, 6  ;;  %v195_v8 = vrot.slane %v192_v5, 4  ;;  %v196_v9 = vrot.slane %v193_v6, 2 }
  0x24   : > { %v198_v11 = vsel %vm197_vm0, %v190_v3, %v194_v7  ;;  %v200_v12 = vsel %vm199_vm1, %v195_v8, %v196_v9  ;;  %209 = sbr.rel (%p318_p12) target bundleno = 51 (0x33), region = 32 }
  0x25   : > { %v202_v13 = vsel %vm201_vm2, %v198_v11, %v200_v12 }
  0x26   : > { %v204_v14 = vmul.f32 %v202_v13, %v188_v10 }
  0x28   : > { %205 = vst [vmem:[%s170_s14] sm:$0xff] %v204_v14 }
  0x29   : > { %v211_v16 = vstv %s555_s30  ;;  %vm213_vm3 = vcmask 1024  }
  0x2f   : > { %v210_v15 = vld [vmem:[%s170_s14] sm:$0x3] }
  0x30   : > { %v212_v17 = vadd.f32 %v211_v16, %v210_v15 }
  0x32   : > { %214 = vst.msk [vmem:[%s170_s14] sm:$0x3] %vm213_vm3, %v212_v17 }
  0x33 PF: > { %s324_s15 = sshll.u32 %s465_s19, 3  ;;  %s231_s26 = sshll.u32 %s170_s14, 4  ;;  %s232_s26 = int_to_ptr.vmem [resolvable:$true] %s231_s26 }
  0x34   : > { %s229_s24 = scalar_lea.hbm %s610_s3, %s324_s15  ;;  %s216_s4 = scalar_lea.sflag [#allocation5], %s168_s9 }
  0x35   : > { %s233_s29 = sshll.u32 %s229_s24, 4  ;;  %s413_s19 = scalar_lea.hbm %s610_s3, 16  ;;  %s234_s29 = int_to_ptr.hbm [resolvable:$true] %s233_s29 }
  0x36   : > { %s407_s5 = sshra.s32 %s234_s29, 4  ;;  %s408_s5 = int_to_ptr.hbm [resolvable:$true] %s407_s5 }
  0x37   : > { %s409_s30 = scalar_lea.hbm %s408_s5, 8  ;;  %p414_p2 = scmp.lt.s32.totalorder %s408_s5, %s610_s3 }
  0x38   : > { %p410_p13 = scmp.ne.s32.totalorder %s408_s5, %s409_s30  ;;  %p415_p3 = scmp.lt.s32.totalorder %s413_s19, %s409_s30 }
  0x3a   : > { %p411_p0 = pnand %p410_p13, %p539_p4  ;;  %p416_p5 = por %p415_p3, %p414_p2 }
  0x3c   : > { %p412_p1 = pneg %p411_p0 }
  0x3e   : > { %p417_p6 = pnand %p416_p5, %p412_p1 }
  0x40   : > { %420 = shalt.err (!%p417_p6)
}
  0x41   : > { %325 = dma.vmem_to_hbm [thread:$0]  (%p539_p4), %s232_s26, 128, %s234_s29, %s216_s4  }
  0x42 PF: > { %p331_p7 = scmp.ge.s32.totalorder %s473_s21, 2  ;;  %s245_s9 = sand.u32 1, %s453_s16  }
  0x43   : > { %s246_s11 = scalar_lea.sflag [#allocation5], %s245_s9 }
  0x44   : > { %p328_p9 = pnand %p331_p7, %p546_p8 }
  0x46   : > { %p329_p10 = pneg %p328_p9 }
  0x48   : > { %448 = dma.done.wait (%p329_p10), %s246_s11, 128  }
  0x49   : > { %450 = vsyncadd (%p329_p10), %s246_s11, 4294967168  ;;  %s24_s21 = sadd.s32 1, %s473_s21   ;;  %s613_s16 = smov %s457_s17 }
  0x4a   : > { %p21_p11 = scmp.ge.s32.totalorder %s24_s21, 4   ;;  %s614_s17 = smov %s461_s18 }
  0x4b   : > { %s615_s18 = smov %s552_s28  ;;  %s616_s19 = smov %s469_s20 }
  0x4c   : > { %s617_s20 = smov %s619_s23  ;;  %23 = sbr.rel (!%p21_p11) target bundleno = 10 (0xa), region = 67 }
  0x51   :  { %252 = vsyncpa [#allocation5], 1 }
  0x52   :  { %254 = vsyncpa [#allocation5 + $0x1], 1 }

</bundles_post_ra>
